<compile_context>
chip_gen: v7x
topology: tpu7x:2x2x1
jax: 0.10.0
libtpu: 0.0.40
codegen_flags: <defaults>
</compile_context>

<pallas_src>
import jax
import jax.numpy as jnp
from jax.experimental import pallas as pl
from jax.experimental.pallas import tpu as pltpu

IN_F = 9
HID = 128
OUT_F = 9


def tictactoe_kernel(xT_ref, w1_ref, b1_ref, w2_ref, b2_ref, oT_ref):
    # xT_ref: (9,   TILE_B)  bf16   -- input boards, feature-major
    # w1_ref: (128, 9)       bf16   -- fc1.weight, PyTorch (out, in) layout
    # b1_ref: (128, 1)       f32
    # w2_ref: (9,   128)     bf16   -- fc2.weight, PyTorch (out, in) layout
    # b2_ref: (9,   1)       f32
    # oT_ref: (9,   TILE_B)  bf16   -- softmax probs, feature-major
    xT = xT_ref[...]

    # fc1 + ReLU:  h^T = W1 @ x^T   (bf16 MXU inputs, f32 accumulate)
    hT = jnp.dot(w1_ref[...], xT, preferred_element_type=jnp.float32)
    hT = jnp.maximum(hT + b1_ref[...], 0.0)                      # (128, TILE_B) f32

    # fc2:  logits^T = W2 @ h^T
    logitsT = jnp.dot(w2_ref[...], hT.astype(w2_ref.dtype),
                      preferred_element_type=jnp.float32)
    logitsT = logitsT + b2_ref[...]                              # (9, TILE_B) f32

    # Softmax over the feature axis (axis 0 here == dim=1 of the original),
    # numerically stable, computed in f32.
    m = jnp.max(logitsT, axis=0, keepdims=True)
    e = jnp.exp(logitsT - m)
    denom = jnp.sum(e, axis=0, keepdims=True)
    oT_ref[...] = (e * pl.reciprocal(denom, approx=True)).astype(oT_ref.dtype)


def tictactoe_forward(x, w1, b1, w2, b2, tile_b=512):
    """Forward pass.

    x : (B, 9) f32.  w1: (128, 9), b1: (128,), w2: (9, 128), b2: (9,)
    (PyTorch nn.Linear layouts).  Returns (B, 9) f32 softmax probabilities.
    """
    B = x.shape[0]

    # Lane-dense tiles: the batch tile (last dim inside the kernel) must be a
    # multiple of 128.
    tile_b = max(128, (tile_b // 128) * 128)
    B_pad = pl.cdiv(B, tile_b) * tile_b
    if B_pad != B:
        x = jnp.pad(x, ((0, B_pad - B), (0, 0)))

    # bf16 kernel I/O, feature-major input (cast + transpose fuse into one op).
    xT = x.astype(jnp.bfloat16).T                      # (9, B_pad)
    w1b = w1.astype(jnp.bfloat16)                      # (128, 9)
    w2b = w2.astype(jnp.bfloat16)                      # (9, 128)
    b1c = b1.astype(jnp.float32).reshape(HID, 1)       # (128, 1)
    b2c = b2.astype(jnp.float32).reshape(OUT_F, 1)     # (9, 1)

    grid = (B_pad // tile_b,)

    oT = pl.pallas_call(
        tictactoe_kernel,
        out_shape=jax.ShapeDtypeStruct((OUT_F, B_pad), jnp.bfloat16),
        grid=grid,
        in_specs=[
            pl.BlockSpec((IN_F, tile_b), lambda i: (0, i)),    # x^T, tiled over batch
            pl.BlockSpec((HID, IN_F), lambda i: (0, 0)),       # W1, resident
            pl.BlockSpec((HID, 1), lambda i: (0, 0)),          # b1, resident
            pl.BlockSpec((OUT_F, HID), lambda i: (0, 0)),      # W2, resident
            pl.BlockSpec((OUT_F, 1), lambda i: (0, 0)),        # b2, resident
        ],
        out_specs=pl.BlockSpec((OUT_F, tile_b), lambda i: (0, i)),
        compiler_params=pltpu.CompilerParams(
            dimension_semantics=("parallel",),
            vmem_limit_bytes=32 * 1024 * 1024,
        ),
    )(xT, w1b, b1c, w2b, b2c)

    # Transpose back to (B, 9) and upcast to f32 (fused into one XLA op) to
    # match nn.Softmax's f32 output dtype.
    out = oT.T.astype(jnp.float32)                     # (B_pad, 9)
    if B_pad != B:
        out = out[:B]
    return out


def init_params(key):
    """Deterministic init mimicking nn.Linear default (U[-1/sqrt(fan_in), +]).

    Weights are kept in the PyTorch-native (out, in) layout.
    """
    k1, k2, k3, k4 = jax.random.split(key, 4)
    bound1 = 1.0 / jnp.sqrt(IN_F)
    bound2 = 1.0 / jnp.sqrt(HID)
    w1 = jax.random.uniform(k1, (HID, IN_F), jnp.float32, -bound1, bound1)
    b1 = jax.random.uniform(k2, (HID,), jnp.float32, -bound1, bound1)
    w2 = jax.random.uniform(k3, (OUT_F, HID), jnp.float32, -bound2, bound2)
    b2 = jax.random.uniform(k4, (OUT_F,), jnp.float32, -bound2, bound2)
    return w1, b1, w2, b2


def reference_forward(x, w1, b1, w2, b2):
    """Pure-JAX reference mirroring the kernel's bf16-I/O / f32-accumulate numerics."""
    xb = x.astype(jnp.bfloat16).astype(jnp.float32)
    w1b = w1.astype(jnp.bfloat16).astype(jnp.float32)
    w2b = w2.astype(jnp.bfloat16).astype(jnp.float32)
    h = jnp.maximum(xb @ w1b.T + b1, 0.0)
    hb = h.astype(jnp.bfloat16).astype(jnp.float32)
    logits = hb @ w2b.T + b2
    return jax.nn.softmax(logits, axis=1)


if __name__ == "__main__":
    key = jax.random.PRNGKey(0)
    kp, kx = jax.random.split(key)
    w1, b1, w2, b2 = init_params(kp)

    # Small batch of tic-tac-toe boards encoded as 9 floats in {-1, 0, 1}.
    # Non-multiple-of-128 batch exercises the padding path; tile_b=128 gives a
    # 2-step pipelined grid.
    B = 200
    x = jax.random.randint(kx, (B, IN_F), -1, 2).astype(jnp.float32)

    out = tictactoe_forward(x, w1, b1, w2, b2, tile_b=128)
    out = jax.block_until_ready(out)

    assert out.shape == (B, OUT_F)
    assert out.dtype == jnp.float32
    ref = reference_forward(x, w1, b1, w2, b2)
    assert jnp.allclose(out, ref, atol=1e-2, rtol=1e-2), "mismatch vs JAX reference"
    assert jnp.allclose(jnp.sum(out, axis=1), 1.0, atol=2e-2), "softmax rows must sum to ~1"

    print("KERNEL_OK")
</pallas_src>

<mosaic_0001>
module attributes {stable_mosaic.version = 11 : i64} {
  func.func @tictactoe_kernel(%arg0: i32, %arg1: memref<9x128xbf16, #tpu.memory_space<vmem>>, %arg2: memref<128x9xbf16, #tpu.memory_space<vmem>>, %arg3: memref<128x1xf32, #tpu.memory_space<vmem>>, %arg4: memref<9x128xbf16, #tpu.memory_space<vmem>>, %arg5: memref<9x1xf32, #tpu.memory_space<vmem>>, %arg6: memref<9x128xbf16, #tpu.memory_space<vmem>>) attributes {dimension_semantics = [#tpu.dimension_semantics<parallel>], iteration_bounds = array<i64: 2>, scalar_prefetch = 0 : i64, scratch_operands = 0 : i64, tpu.core_type = #tpu.core_type<tc>, window_params = [{transform_indices = @transform_0, window_bounds = array<i64: 9, 128>}, {pipeline_mode = #tpu.pipeline_mode<synchronous>, transform_indices = @transform_1, window_bounds = array<i64: 128, 9>}, {pipeline_mode = #tpu.pipeline_mode<synchronous>, transform_indices = @transform_2, window_bounds = array<i64: 128, 1>}, {pipeline_mode = #tpu.pipeline_mode<synchronous>, transform_indices = @transform_3, window_bounds = array<i64: 9, 128>}, {pipeline_mode = #tpu.pipeline_mode<synchronous>, transform_indices = @transform_4, window_bounds = array<i64: 9, 1>}, {transform_indices = @transform_5, window_bounds = array<i64: 9, 128>}]} {
    %c0 = arith.constant 0 : index
    %c0_0 = arith.constant 0 : index
    %0 = vector.load %arg1[%c0, %c0_0] : memref<9x128xbf16, #tpu.memory_space<vmem>>, vector<9x128xbf16>
    %c0_1 = arith.constant 0 : index
    %c0_2 = arith.constant 0 : index
    %1 = vector.load %arg2[%c0_1, %c0_2] : memref<128x9xbf16, #tpu.memory_space<vmem>>, vector<128x9xbf16>
    %cst = arith.constant dense<0.000000e+00> : vector<128x128xf32>
    %2 = tpu.matmul %1, %0, %cst {dimension_numbers = #tpu.dot_dimension_numbers<[1], [0], [0], [1], [0, 0, 1, 1], [], []>} : vector<128x9xbf16>, vector<9x128xbf16>, vector<128x128xf32> -> vector<128x128xf32>
    %c0_3 = arith.constant 0 : index
    %c0_4 = arith.constant 0 : index
    %3 = vector.load %arg3[%c0_3, %c0_4] : memref<128x1xf32, #tpu.memory_space<vmem>>, vector<128x1xf32>
    %4 = vector.broadcast %3 : vector<128x1xf32> to vector<128x128xf32>
    %5 = arith.addf %2, %4 : vector<128x128xf32>
    %cst_5 = arith.constant 0.000000e+00 : f32
    %6 = vector.broadcast %cst_5 : f32 to vector<128x128xf32>
    %7 = arith.maximumf %5, %6 : vector<128x128xf32>
    %c0_6 = arith.constant 0 : index
    %c0_7 = arith.constant 0 : index
    %8 = vector.load %arg4[%c0_6, %c0_7] : memref<9x128xbf16, #tpu.memory_space<vmem>>, vector<9x128xbf16>
    %9 = arith.truncf %7 : vector<128x128xf32> to vector<128x128xbf16>
    %cst_8 = arith.constant dense<0.000000e+00> : vector<9x128xf32>
    %10 = tpu.matmul %8, %9, %cst_8 {dimension_numbers = #tpu.dot_dimension_numbers<[1], [0], [0], [1], [0, 0, 1, 1], [], []>} : vector<9x128xbf16>, vector<128x128xbf16>, vector<9x128xf32> -> vector<9x128xf32>
    %c0_9 = arith.constant 0 : index
    %c0_10 = arith.constant 0 : index
    %11 = vector.load %arg5[%c0_9, %c0_10] : memref<9x1xf32, #tpu.memory_space<vmem>>, vector<9x1xf32>
    %12 = vector.broadcast %11 : vector<9x1xf32> to vector<9x128xf32>
    %13 = arith.addf %10, %12 : vector<9x128xf32>
    %cst_11 = arith.constant dense<0xFF800000> : vector<128xf32>
    %14 = vector.multi_reduction <maximumf>, %13, %cst_11 [0] : vector<9x128xf32> to vector<128xf32>
    %15 = vector.shape_cast %14 : vector<128xf32> to vector<1x128xf32>
    %16 = vector.broadcast %15 : vector<1x128xf32> to vector<9x128xf32>
    %17 = arith.subf %13, %16 : vector<9x128xf32>
    %18 = math.exp %17 : vector<9x128xf32>
    %cst_12 = arith.constant dense<0.000000e+00> : vector<128xf32>
    %19 = vector.multi_reduction <add>, %18, %cst_12 [0] : vector<9x128xf32> to vector<128xf32>
    %20 = vector.shape_cast %19 : vector<128xf32> to vector<1x128xf32>
    %21 = tpu.reciprocal %20 {approx = true} : vector<1x128xf32> -> vector<1x128xf32>
    %22 = vector.broadcast %21 : vector<1x128xf32> to vector<9x128xf32>
    %23 = arith.mulf %18, %22 : vector<9x128xf32>
    %24 = arith.truncf %23 : vector<9x128xf32> to vector<9x128xbf16>
    %c0_13 = arith.constant 0 : index
    %c0_14 = arith.constant 0 : index
    %25 = vector.load %arg6[%c0_13, %c0_14] : memref<9x128xbf16, #tpu.memory_space<vmem>>, vector<9x128xbf16>
    tpu.vector_store %arg6[%c0_13, %c0_14], %24 {strides = array<i32>} : memref<9x128xbf16, #tpu.memory_space<vmem>>, vector<9x128xbf16>,
    return
  }
  func.func @transform_0(%arg0: i32) -> (i32, i32) {
    %c0_i32 = arith.constant 0 : i32
    %c0_i32_0 = arith.constant 0 : i32
    return %c0_i32, %arg0 : i32, i32
  }
  func.func @transform_1(%arg0: i32) -> (i32, i32) {
    %c0_i32 = arith.constant 0 : i32
    %c0_i32_0 = arith.constant 0 : i32
    %c0_i32_1 = arith.constant 0 : i32
    return %c0_i32, %c0_i32_0 : i32, i32
  }
  func.func @transform_2(%arg0: i32) -> (i32, i32) {
    %c0_i32 = arith.constant 0 : i32
    %c0_i32_0 = arith.constant 0 : i32
    %c0_i32_1 = arith.constant 0 : i32
    return %c0_i32, %c0_i32_0 : i32, i32
  }
  func.func @transform_3(%arg0: i32) -> (i32, i32) {
    %c0_i32 = arith.constant 0 : i32
    %c0_i32_0 = arith.constant 0 : i32
    %c0_i32_1 = arith.constant 0 : i32
    return %c0_i32, %c0_i32_0 : i32, i32
  }
  func.func @transform_4(%arg0: i32) -> (i32, i32) {
    %c0_i32 = arith.constant 0 : i32
    %c0_i32_0 = arith.constant 0 : i32
    %c0_i32_1 = arith.constant 0 : i32
    return %c0_i32, %c0_i32_0 : i32, i32
  }
  func.func @transform_5(%arg0: i32) -> (i32, i32) {
    %c0_i32 = arith.constant 0 : i32
    %c0_i32_0 = arith.constant 0 : i32
    return %c0_i32, %arg0 : i32, i32
  }
}

</mosaic_0001>

<bundles_post_ra>
// kernel: tpu_custom_call.1
= control target key start
LH: loop header
LB: loop body
LE: loop exit
PB: predicated region body
PF: predicated region fallthrough
CT: control target
= control target key end

     0   :  { %10 = vsyncpa [#allocation4], 0  ;;  %s1237_s0 = inlined_call_operand.vmem [shape: bf16[9,256], index: 0, kind: input, shape index: {}]   ;;  %s1238_s1 = inlined_call_operand.vmem [shape: bf16[128,9], index: 1, kind: input, shape index: {}]   ;;  %s1239_s2 = inlined_call_operand.vmem [shape: f32[128,1], index: 2, kind: input, shape index: {}]   ;;  %s1240_s3 = inlined_call_operand.vmem [shape: bf16[9,128], index: 3, kind: input, shape index: {}]   ;;  %s1241_s4 = inlined_call_operand.vmem [shape: f32[9,1], index: 4, kind: input, shape index: {}]   ;;  %s1242_s5 = inlined_call_operand.hbm [shape: bf16[9,256], index: 5, kind: output, shape index: {}]  }
   0x1   :  { %12 = vsyncpa [#allocation4 + $0x1], 0  ;;  %s1020_s18 = smov 0   ;;  %s1022_s19 = smov 0  }
   0x2   :  { %s1024_s20 = smov 0   ;;  %s1026_s21 = smov 0  }
   0x3 LB: > { %s763_s22 = sadd.s32 4294967295, %s980_s21   ;;  %s764_s23 = sadd.s32 4294967294, %s980_s21   ;;  %s980_s21 = sphi %s1026_s21, %s1248_s21   ;;  %s976_s20 = sphi %s1024_s20, %s1247_s20   ;;  %s972_s19 = sphi %s1022_s19, %s1246_s19   ;;  %s968_s18 = sphi %s1020_s18, %s1245_s18  }
   0x4   : > { %s1043_s24 = sadd.s32 1, %s980_s21   ;;  %s25_s25 = sadd.s32 1, %s976_s20 }
   0x5   : > { %s22_s26 = ssub.s32 %s980_s21, %s1043_s24  ;;  %p32_p0 = scmp.ne.s32.totalorder %s976_s20, %s972_s19 }
   0x6   : > { %p23_p1 = scmp.eq.s32.totalorder %s22_s26, 0  ;;  %p33_p2 = scmp.eq.s32.totalorder %s980_s21, 0 }
   0x7   : > { %p146_p3 = scmp.eq.s32.totalorder %s763_s22, 1  ;;  %p151_p4 = scmp.ne.s32.totalorder %s972_s19, %s968_s18 }
   0x8   : > { %s1056_s27 = scalar_select %p23_p1, %s976_s20, %s25_s25  }
   0x9   : > { %p34_p5 = por %p33_p2, %p32_p0  ;;  %p1058_p6 = por %p146_p3, %p32_p0 }
   0xa   : > { %p152_p7 = scmp.eq.s32.totalorder %s764_s23, 1  ;;  %p766_p9 = scmp.ge.s32.totalorder %s980_s21, 2 }
   0xc   : > { %p1062_p8 = por %p152_p7, %p151_p4  ;;  %180 = sbr.rel (%p766_p9) target bundleno = 26 (0x1a), region = 32 }
  0x13   : > { %183 = sbr.rel (!%p34_p5) target bundleno = 26 (0x1a), region = 36  ;;  %s185_s30 = sand.u32 (%p34_p5), 1, %s976_s20  }
  0x14   : > { %s768_s6 = sshll.u32 (%p34_p5), %s980_s21, 2  ;;  %s767_s7 = sshll.u32 (%p34_p5), %s185_s30, 3 }
  0x15   : > { %s189_s10 = scalar_lea.vmem (%p34_p5), %s1237_s0, %s768_s6  ;;  %s187_s11 = scalar_lea.vmem (%p34_p5), [#allocation2], %s767_s7 }
  0x16   : > { %v205_v0 = vld [vmem:[%s189_s10] sm:$0xf] (%p34_p5)  ;;  %v207_v1 = vld [vmem:[%s189_s10 + $0x8] sm:$0xf] (%p34_p5) }
  0x17   : > { %206 = vst [vmem:[%s187_s11] sm:$0xf] (%p34_p5), %v205_v0  ;;  %208 = vst [vmem:[%s187_s11 + $0x4] sm:$0xf] (%p34_p5), %v207_v1 }
  0x1a PF: > { %p769_p10 = scmp.ge.s32.totalorder %s980_s21, 1  ;;  %p234_p11 = scmp.lt.s32.totalorder %s980_s21, 3 }
  0x1c   : > { %p235_p12 = pnand %p769_p10, %p234_p11 }
  0x1d   : > { %s241_s12 = sand.u32 (!%p235_p12), 1, %s972_s19   ;;  %vm453_vm0 = vcmask (!%p235_p12), 1043456   ;;  %vm454_vm1 = vcmask (!%p235_p12), 1044480   ;;  %v982_v2 = vmov (!%p235_p12), 65535   ;;  %v903_v4 = vld [vmem:[%s1238_s1] sm:$0xff] (!%p235_p12)   ;;  %vm428_vm2 = vcmask (!%p235_p12), 72704  }
  0x1e   : > { %238 = sbr.rel (%p235_p12) target bundleno = 585 (0x249), region = 77  ;;  %s1079_s13 = sshll.u32 (!%p235_p12), %s241_s12, 3  ;;  %v455_v3 = vsel (!%p235_p12), %vm453_vm0, 4294967295, %v982_v2  ;;  %818 = vmatprep.mubr.msk.bf16.mxu0 (!%p235_p12), %vm428_vm2, %v903_v4  ;;  %v983_v8 = vmov (!%p235_p12), 0   ;;  %v904_v9 = vld [vmem:[%s1238_s1 + $0x8] sm:$0xff] (!%p235_p12)   ;;  %v905_v10 = vld [vmem:[%s1238_s1 + $0x10] sm:$0xff] (!%p235_p12)  }
  0x1f   : > { %v456_v5 = vsel (!%p235_p12), %vm454_vm1, %v455_v3, 0  ;;  %s243_s16 = scalar_lea.vmem (!%p235_p12), [#allocation2], %s1079_s13  ;;  %900 = vset.pattern.permute.xlu0 (!%p235_p12), %v983_v8  ;;  %901 = vset.pattern.permute.xlu1 (!%p235_p12), %v983_v8  ;;  %v287_v11 = vld [vmem:[%s1239_s2] sm:$0xff] (!%p235_p12)  ;;  %v289_v12 = vld [vmem:[%s1239_s2 + $0x10] sm:$0xff] (!%p235_p12)  ;;  %v288_v13 = vld [vmem:[%s1239_s2 + $0x8] sm:$0xff] (!%p235_p12)  ;;  %v984_v34 = vmov (!%p235_p12), 0.0  }
  0x20   : > { %v902_v6 = vld [vmem:[%s243_s16] sm:$0x1f] (!%p235_p12)   ;;  %305 = vperm.xlu0 (!%p235_p12), %900, %v287_v11   ;;  %315 = vperm.xlu1 (!%p235_p12), %901, %v289_v12   ;;  %v290_v14 = vld [vmem:[%s1239_s2 + $0x18] sm:$0xff] (!%p235_p12)  ;;  %v293_v19 = vld [vmem:[%s1239_s2 + $0x30] sm:$0xff] (!%p235_p12)  ;;  %vm985_vm3 = vmmov (!%p235_p12), 0   ;;  %vm642_vm4 = vcmask (!%p235_p12), 1040384  }
  0x21   : > { %v458_v7 = vand.u32 (!%p235_p12), %v902_v6, %v456_v5  ;;  %v906_v15 = vld [vmem:[%s1238_s1 + $0x18] sm:$0xff] (!%p235_p12)   ;;  %v907_v16 = vld [vmem:[%s1238_s1 + $0x20] sm:$0xff] (!%p235_p12)   ;;  %v292_v18 = vld [vmem:[%s1239_s2 + $0x28] sm:$0xff] (!%p235_p12)  ;;  %834 = vmatprep.subr.bf16.mxu1 (!%p235_p12), %v984_v34  ;;  %850 = vmatprep.mubr.msk.bf16.mxu1 (!%p235_p12), %vm985_vm3, %v984_v34  ;;  %s267_s11 = scalar_lea.vmem (!%p235_p12), [#allocation3], %s1079_s13  ;;  %vm678_vm5 = vsmask.f32 (!%p235_p12), 256 }
  0x22   : > { %v291_v17 = vld [vmem:[%s1239_s2 + $0x20] sm:$0xff] (!%p235_p12)  ;;  %v294_v20 = vld [vmem:[%s1239_s2 + $0x38] sm:$0xff] (!%p235_p12)  ;;  %v908_v21 = vld [vmem:[%s1238_s1 + $0x28] sm:$0xff] (!%p235_p12)   ;;  %s696_s14 = sshll.u32 (!%p235_p12), %s267_s11, 4  ;;  %s793_s15 = sshll.u32 (!%p235_p12), %s763_s22, 6  ;;  %s1185_s14 = int_to_ptr.vmem [resolvable:$true] %s696_s14 }
  0x23   : > { %816 = vmatprep.subr.bf16.mxu0 (!%p235_p12), %v458_v7  ;;  %v909_v22 = vld [vmem:[%s1238_s1 + $0x30] sm:$0xff] (!%p235_p12)   ;;  %v295_v23 = vld [vmem:[%s1239_s2 + $0x40] sm:$0xff] (!%p235_p12)  ;;  %v296_v24 = vld [vmem:[%s1239_s2 + $0x48] sm:$0xff] (!%p235_p12)  ;;  %s1191_s17 = scalar_lea.hbm (!%p235_p12), %s1242_s5, %s793_s15  ;;  %s1195_s22 = scalar_lea.sflag (!%p235_p12), [#allocation4], %s241_s12 }
  0x24   : > { %817 = vmatpush3.bf16.msra.mxu0 (!%p235_p12), %v458_v7  ;;  %310 = vperm.xlu0 (!%p235_p12), %900, %v288_v13   ;;  %v297_v25 = vld [vmem:[%s1239_s2 + $0x50] sm:$0xff] (!%p235_p12)  ;;  %v298_v26 = vld [vmem:[%s1239_s2 + $0x58] sm:$0xff] (!%p235_p12)  ;;  %v299_v28 = vld [vmem:[%s1239_s2 + $0x60] sm:$0xff] (!%p235_p12)  ;;  %s918_s23 = scalar_lea.vmem (!%p235_p12), %s1185_s14, 128  ;;  %s986_s25 = smov (!%p235_p12), [#allocation3]  }
  0x25   : > { %320 = vperm.xlu1 %901, %v290_v14   ;;  %v910_v27 = vld [vmem:[%s1238_s1 + $0x38] sm:$0xff]   ;;  %v300_v29 = vld [vmem:[%s1239_s2 + $0x68] sm:$0xff]  ;;  %v301_v30 = vld [vmem:[%s1239_s2 + $0x70] sm:$0xff]  ;;  %p919_p13 = scmp.ne.s32.totalorder %s1185_s14, %s918_s23  ;;  %s922_s26 = sshll.u32 %s986_s25, 4  ;;  %s923_s26 = int_to_ptr.vmem [resolvable:$false] %s922_s26 }
  0x26   : > { %v302_v31 = vld [vmem:[%s1239_s2 + $0x78] sm:$0xff]  ;;  %v584_v32 = vld [vmem:[%s1241_s4 + $0x8] sm:$0x1]  ;;  %v583_v33 = vld [vmem:[%s1241_s4] sm:$0xff]  ;;  %s924_s30 = scalar_lea.vmem %s923_s26, 256  ;;  %p925_p2 = scmp.lt.s32.totalorder %s1185_s14, %s923_s26 }
  0x27   : > { %819 = vmatmul.mubr.msk.bf16.vlgmr.msra.gmra.mrb[0].mxu0 %vm428_vm2, %v904_v9  ;;  %vm679_vm6 = vmand %vm642_vm4, %vm678_vm5  ;;  %p920_p0 = pnand %p919_p13, %p1058_p6  ;;  %p926_p3 = scmp.lt.s32.totalorder %s924_s30, %s918_s23 }
  0x28   : > { %822 = vmatprep.mubr.msk.bf16.mxu0 %vm428_vm2, %v905_v10  ;;  %325 = vperm.xlu0 %900, %v291_v17  }
  0x29   : > { %330 = vperm.xlu1 %901, %v292_v18   ;;  %p921_p1 = pneg %p920_p0  ;;  %p927_p4 = por %p926_p3, %p925_p2 }
  0x2b   : > { %p928_p5 = pnand %p927_p4, %p921_p1 }
  0x2c   : > { %335 = vperm.xlu0 %900, %v293_v19  }
  0x2d   : > { %340 = vperm.xlu1 %901, %v294_v20  }
  0x2f   : > { %823 = vmatmul.mubr.msk.bf16.gmra.mrb[4].mxu0 %vm428_vm2, %v906_v15 }
  0x30   : > { %826 = vmatprep.mubr.msk.bf16.mxu0 %vm428_vm2, %v907_v16  ;;  %345 = vperm.xlu0 %900, %v295_v23  }
  0x31   : > { %350 = vperm.xlu1 %901, %v296_v24  }
  0x34   : > { %355 = vperm.xlu0 %900, %v297_v25  }
  0x35   : > { %360 = vperm.xlu1 %901, %v298_v26  }
  0x37   : > { %827 = vmatmul.mubr.msk.bf16.gmra.mrb[8].mxu0 %vm428_vm2, %v908_v21 }
  0x38   : > { %830 = vmatprep.mubr.msk.bf16.mxu0 %vm428_vm2, %v909_v22  ;;  %365 = vperm.xlu0 %900, %v299_v28  }
  0x39   : > { %370 = vperm.xlu1 %901, %v300_v29  }
  0x3c   : > { %375 = vperm.xlu0 %900, %v301_v30  }
  0x3d   : > { %380 = vperm.xlu1 %901, %v302_v31  }
  0x3f   : > { %831 = vmatmul.mubr.msk.bf16.gmra.mrb[12].mxu0 %vm428_vm2, %v910_v27 }
  0x40   : > { %592 = vperm.xlu0 %900, %v584_v32  }
  0x41   : > { %587 = vperm.xlu1 %901, %v583_v33  }
  0x9f   : > { %v306_v35 = vpop.permute.xlu0 %305  ;;  %v316_v36 = vpop.permute.xlu1 %315 }
  0xa3   : > { %v311_v37 = vpop.permute.xlu0 %310 }
  0xa4   : > { %v321_v38 = vpop.permute.xlu1 %320 }
  0xa7   : > { %v326_v39 = vpop.permute.xlu0 %325 }
  0xa8   : > { %v331_v40 = vpop.permute.xlu1 %330 }
  0xab   : > { %v336_v41 = vpop.permute.xlu0 %335 }
  0xac   : > { %v341_v45 = vpop.permute.xlu1 %340 }
  0xaf   : > { %v346_v53 = vpop.permute.xlu0 %345 }
  0xb0   : > { %v351_v57 = vpop.permute.xlu1 %350 }
  0xb3   : > { %v356_v2 = vpop.permute.xlu0 %355 }
  0xb4   : > { %v361_v6 = vpop.permute.xlu1 %360 }
  0xb7   : > { %v366_v14 = vpop.permute.xlu0 %365 }
  0xb8   : > { %v371_v19 = vpop.permute.xlu1 %370 }
  0xbb   : > { %v376_v26 = vpop.permute.xlu0 %375 }
  0xbc   : > { %v381_v31 = vpop.permute.xlu1 %380 }
  0xfa   : > { %v820_v42 = vpop.f32.mrb[0].mxu0 }
  0xfb   : > { %v503_v43 = vadd.f32 %v820_v42, %v316_v36  ;;  %v494_v44 = vpop.f32.mrb[1].mxu0 }
  0xfc   : > { %v495_v46 = vadd.f32 %v494_v44, %v306_v35  ;;  %v821_v47 = vpop.f32.mrb[2].mxu0  ;;  %v911_v44 = vld [vmem:[%s1240_s3] sm:$0x1f]  }
  0xfd   : > { %v506_v48 = vadd.f32 %v821_v47, %v321_v38  ;;  %v497_v49 = vpop.f32.mrb[3].mxu0  ;;  %v559_v51 = vmax.f32 %v503_v43, 0.0  ;;  %v593_v47 = vpop.permute.xlu0 %592 }
  0xfe   : > { %v498_v50 = vadd.f32 %v497_v49, %v311_v37  ;;  %v557_v54 = vmax.f32 %v495_v46, 0.0  ;;  %v588_v49 = vpop.permute.xlu1 %587 }
  0xff   : > { %v560_v52 = vmax.f32 %v506_v48, 0.0 }
 0x100   : > { %v558_v55 = vmax.f32 %v498_v50, 0.0 }
 0x101   : > { %v576_v56 = vpack.c.bf16 %v560_v52, %v559_v51 }
 0x102   : > { %v824_v58 = vpop.f32.mrb[4].mxu0  ;;  %v575_v59 = vpack.c.bf16 %v558_v55, %v557_v54 }
 0x103   : > { %v519_v60 = vadd.f32 %v824_v58, %v336_v41  ;;  %v510_v61 = vpop.f32.mrb[5].mxu0 }
 0x104   : > { %v511_v62 = vadd.f32 %v510_v61, %v326_v39  ;;  %v825_v63 = vpop.f32.mrb[6].mxu0  ;;  %835 = vmatpush3.bf16.msra.mxu1 %v575_v59 }
 0x105   : > { %v522_v0 = vadd.f32 %v825_v63, %v341_v45  ;;  %v513_v1 = vpop.f32.mrb[7].mxu0  ;;  %836 = vmatprep.subr.bf16.mxu1 %v984_v34  ;;  %v563_v4 = vmax.f32 %v519_v60, 0.0 }
 0x106   : > { %v514_v3 = vadd.f32 %v513_v1, %v331_v40  ;;  %v561_v7 = vmax.f32 %v511_v62, 0.0 }
 0x107   : > { %v564_v5 = vmax.f32 %v522_v0, 0.0 }
 0x108   : > { %v562_v8 = vmax.f32 %v514_v3, 0.0  ;;  %837 = vmatpush3.bf16.msra.mxu1 %v576_v56 }
 0x109   : > { %v578_v9 = vpack.c.bf16 %v564_v5, %v563_v4  ;;  %838 = vmatprep.subr.bf16.mxu1 %v984_v34 }
 0x10a   : > { %v577_v10 = vpack.c.bf16 %v562_v8, %v561_v7  ;;  %v828_v11 = vpop.f32.mrb[8].mxu0 }
 0x10b   : > { %v535_v12 = vadd.f32 %v828_v11, %v356_v2  ;;  %v526_v13 = vpop.f32.mrb[9].mxu0 }
 0x10c   : > { %v527_v15 = vadd.f32 %v526_v13, %v346_v53  ;;  %v829_v16 = vpop.f32.mrb[10].mxu0  ;;  %839 = vmatpush3.bf16.msra.mxu1 %v577_v10  ;;  %v680_v13 = vld [vmem:[%s267_s11 + $0x4] sm:$0x1] }
 0x10d   : > { %v538_v17 = vadd.f32 %v829_v16, %v361_v6  ;;  %v529_v18 = vpop.f32.mrb[11].mxu0  ;;  %840 = vmatprep.subr.bf16.mxu1 %v984_v34  ;;  %v567_v21 = vmax.f32 %v535_v12, 0.0 }
 0x10e   : > { %v530_v20 = vadd.f32 %v529_v18, %v351_v57  ;;  %v565_v23 = vmax.f32 %v527_v15, 0.0 }
 0x10f   : > { %v568_v22 = vmax.f32 %v538_v17, 0.0 }
 0x110   : > { %v566_v24 = vmax.f32 %v530_v20, 0.0  ;;  %841 = vmatpush3.bf16.msra.mxu1 %v578_v9 }
 0x111   : > { %v580_v25 = vpack.c.bf16 %v568_v22, %v567_v21  ;;  %842 = vmatprep.subr.bf16.mxu1 %v984_v34 }
 0x112   : > { %v579_v27 = vpack.c.bf16 %v566_v24, %v565_v23  ;;  %v832_v28 = vpop.f32.mrb[12].mxu0 }
 0x113   : > { %v551_v29 = vadd.f32 %v832_v28, %v376_v26  ;;  %v542_v30 = vpop.f32.mrb[13].mxu0 }
 0x114   : > { %v543_v32 = vadd.f32 %v542_v30, %v366_v14  ;;  %v833_v33 = vpop.f32.mrb[14].mxu0  ;;  %843 = vmatpush3.bf16.msra.mxu1 %v579_v27 }
 0x115   : > { %v554_v35 = vadd.f32 %v833_v33, %v381_v31  ;;  %v545_v36 = vpop.f32.mrb[15].mxu0  ;;  %844 = vmatprep.subr.bf16.mxu1 %v984_v34  ;;  %v571_v38 = vmax.f32 %v551_v29, 0.0 }
 0x116   : > { %v546_v37 = vadd.f32 %v545_v36, %v371_v19  ;;  %v569_v40 = vmax.f32 %v543_v32, 0.0 }
 0x117   : > { %v572_v39 = vmax.f32 %v554_v35, 0.0 }
 0x118   : > { %v570_v41 = vmax.f32 %v546_v37, 0.0  ;;  %845 = vmatpush3.bf16.msra.mxu1 %v580_v25 }
 0x119   : > { %v582_v42 = vpack.c.bf16 %v572_v39, %v571_v38  ;;  %846 = vmatprep.subr.bf16.mxu1 %v984_v34 }
 0x11a   : > { %v581_v43 = vpack.c.bf16 %v570_v41, %v569_v40 }
 0x11c   : > { %847 = vmatpush3.bf16.msra.mxu1 %v581_v43 }
 0x11d   : > { %848 = vmatprep.subr.bf16.mxu1 %v984_v34 }
 0x120   : > { %849 = vmatpush3.bf16.msra.mxu1 %v582_v42 }
 0x123   : > { %851 = vmatmul.mubr.bf16.vlgmr.msra.gmra.mrb[0].mxu1 %v911_v44 }
 0x1f6   : > { %v635_v45 = vpop.f32.mrb[0].mxu1 }
 0x1f7   : > { %v852_v46 = vpop.f32.mrb[1].mxu1  ;;  %v636_v52 = vadd.f32 %v635_v45, %v588_v49 }
 0x1f8   : > { %v638_v48 = vpop.f32.mrb[2].mxu1 }
 0x1f9   : > { %v639_v50 = vadd.f32 %v638_v48, %v593_v47  ;;  %v853_v51 = vpop.f32.mrb[3].mxu1 }
 0x1fb   : > { %v643_v53 = vsel %vm642_vm4, %v639_v50, -inf }
 0x1fc   : > { %v644_v54 = vmax.f32 %v636_v52, %v643_v53 }
 0x1fe   : > { %v645_v55 = vrot.slane %v644_v54, 4 }
 0x200   : > { %v646_v34 = vmax.f32 %v644_v54, %v645_v55 }
 0x202   : > { %v647_v56 = vrot.slane %v646_v34, 2 }
 0x204   : > { %v648_v57 = vmax.f32 %v646_v34, %v647_v56 }
 0x206   : > { %v649_v58 = vrot.slane %v648_v57, 1 }
 0x208   : > { %v650_v59 = vmax.f32 %v648_v57, %v649_v58 }
 0x20a   : > { %v651_v60 = vsub.f32 %v636_v52, %v650_v59  ;;  %v652_v61 = vsub.f32 %v639_v50, %v650_v59 }
 0x20c   : > { %v653_v62 = vmul.f32 1.442695, %v651_v60  ;;  %v655_v63 = vmul.f32 1.442695, %v652_v61 }
 0x20e   : > { %912 = vpow2.f32 %v653_v62 }
 0x20f   : > { %914 = vpow2.f32 %v655_v63 }
 0x218   : > { %v913_v0 = vpop.eup %912 }
 0x219   : > { %v915_v1 = vpop.eup %914 }
 0x21a   : > { %v657_v2 = vsel %vm642_vm4, %v915_v1, 0.0 }
 0x21b   : > { %v658_v3 = vadd.f32 %v913_v0, %v657_v2 }
 0x21d   : > { %v659_v4 = vrot.slane %v658_v3, 4 }
 0x21f   : > { %v660_v5 = vadd.f32 %v659_v4, %v658_v3 }
 0x221   : > { %v661_v6 = vrot.slane %v660_v5, 2 }
 0x223   : > { %v662_v7 = vadd.f32 %v661_v6, %v660_v5 }
 0x225   : > { %v663_v8 = vrot.slane %v662_v7, 1 }
 0x227   : > { %v664_v9 = vadd.f32 %v663_v8, %v662_v7 }
 0x229   : > { %916 = vrcp.f32 %v664_v9 }
 0x233   : > { %v917_v10 = vpop.eup %916 }
 0x234   : > { %v667_v11 = vmul.f32 %v917_v10, %v915_v1  ;;  %v666_v12 = vmul.f32 %v917_v10, %v913_v0 }
 0x236   : > { %v797_v14 = vpack.c.bf16 %v667_v11, %v667_v11  ;;  %v796_v15 = vpack.c.bf16 %v666_v12, %v666_v12 }
 0x238   : > { %v681_v16 = vsel %vm679_vm6, %v797_v14, %v680_v13  ;;  %676 = vst [vmem:[%s267_s11] sm:$0xf] %v796_v15 }
 0x239   : > { %682 = vst [vmem:[%s267_s11 + $0x4] sm:$0x1] %v681_v16 }
 0x23a   : > { %931 = shalt.err (!%p928_p5)
}
 0x23b   : > { %s932_s12 = scalar_lea.hbm %s1191_s17, 128  ;;  %s936_s8 = scalar_lea.hbm %s1242_s5, 256 }
 0x23c   : > { %p933_p7 = scmp.ne.s32.totalorder %s1191_s17, %s932_s12  ;;  %p937_p12 = scmp.lt.u32.totalorder %s1191_s17, %s1242_s5 }
 0x23d   : > { %p938_p13 = scmp.lt.u32.totalorder %s936_s8, %s932_s12  ;;  %p940_p1 = scmp.lt.u32.totalorder %s932_s12, %s1191_s17 }
 0x23e   : > { %p934_p10 = pnand %p933_p7, %p1058_p6 }
 0x23f   : > { %p939_p0 = por %p938_p13, %p937_p12 }
 0x240   : > { %p935_p11 = pneg %p934_p10 }
 0x241   : > { %p941_p2 = por %p940_p1, %p939_p0 }
 0x243   : > { %p942_p3 = pnand %p941_p2, %p935_p11 }
 0x245   : > { %945 = shalt.err (!%p942_p3)
}
 0x246   : > { %s987_s11 = smov 64   ;;  %s988_s15 = smov 128  }
 0x247   : > { %s989_s13 = smov 4  }
 0x248   : > { %854 = dma.vmem_to_hbm [thread:$0]  (%p1058_p6), %s1185_s14, 128, %s1191_s17, %s1195_s22, %s987_s11, %s988_s15, %s989_s13  }
 0x249 PF: > { %s711_s16 = sand.u32 1, %s968_s18   ;;  %p857_p4 = pnand %p766_p9, %p1062_p8 }
 0x24a   : > { %s712_s23 = scalar_lea.sflag [#allocation4], %s711_s16 }
 0x24b   : > { %963 = dma.done.wait (!%p857_p4), %s712_s23, 128  }
 0x24c   : > { %965 = vsyncadd (!%p857_p4), %s712_s23, 4294967168  ;;  %p15_p5 = scmp.ge.s32.totalorder %s1043_s24, 4   ;;  %s1245_s18 = smov %s972_s19 }
 0x24d   : > { %s1246_s19 = smov %s976_s20  ;;  %s1247_s20 = smov %s1056_s27 }
 0x24e   : > { %s1248_s21 = smov %s1043_s24  ;;  %17 = sbr.rel (!%p15_p5) target bundleno = 3 (0x3), region = 121 }
 0x255   :  { %717 = vsyncpa [#allocation4], 1 }
 0x256   :  { %719 = vsyncpa [#allocation4 + $0x1], 1 }

</bundles_post_ra>
